<compile_context>
chip_gen: v7x
topology: tpu7x:2x2x1
jax: 0.10.0
libtpu: 0.0.40
codegen_flags: <defaults>
</compile_context>

<pallas_src>
import math

import jax
import jax.numpy as jnp
from jax.experimental import pallas as pl
from jax.experimental.pallas import tpu as pltpu


def _pe2d_add_kernel(x_ref, pe_row_ref, pe_col_ref, o_ref):
    # x_ref:      (1, TI, L, K)   tile of the pair tensor (i rows, all j, all K)
    # pe_row_ref: (1, TI, 1, K)   [emb(i) | 0]  -> broadcast over the j axis
    # pe_col_ref: (1, 1,  L, K)   [0 | emb(j)]  -> broadcast over the i axis
    x = x_ref[...].astype(jnp.float32)
    pe_r = pe_row_ref[...].astype(jnp.float32)
    pe_c = pe_col_ref[...].astype(jnp.float32)
    # One of pe_r / pe_c is exactly zero in every channel, so this matches the
    # reference x + pe bit-for-bit in f32.
    o_ref[...] = (x + pe_r + pe_c).astype(o_ref.dtype)


def _choose_row_tile(L, K, itemsize, *, target_rows=1024,
                     vmem_budget_bytes=12 * 1024 * 1024):
    """Pick TI (i-rows per grid step), a divisor of L.

    Prefers the smallest divisor whose tile covers >= target_rows pair rows
    (perf review: 512-1024 rows/tile ~= 85% of the HBM roofline), subject to a
    conservative VMEM footprint that fits every generation (v5e 16 MiB scoped
    default once raised, v7x 64 MiB physical).
    """
    best = 1
    for ti in range(1, L + 1):
        if L % ti:
            continue
        rows = ti * L
        # double-buffered x-in + out tiles, plus the (small) pe tables
        foot = 4 * rows * K * itemsize + 4 * (ti + L) * K * 4
        if foot > vmem_budget_bytes:
            continue
        best = ti
        if rows >= target_rows:
            break
    return best


def positional_encoding_2d(x, idx_s, *, row_tile=None):
    """
    Args:
      x:     [B, L, L, K] pair tensor (f32 or bf16).
      idx_s: [B, L] residue indices (int or float).
      row_tile: optional override for the i-tile size (must divide L).
    Returns:
      [B, L, L, K] = x + pe, same dtype as x (dropout = eval-mode identity).
    """
    B, L, L2, K = x.shape
    assert L == L2, "x must be a square pair tensor [B, L, L, K]"
    assert K % 4 == 0, "d_model must be divisible by 4"
    k_half = K // 2

    # --- tiny sinusoid tables, O(B*L*K/2): L x smaller than x ---------------
    div_term = jnp.exp(
        jnp.arange(0.0, k_half, 2.0, dtype=jnp.float32)
        * -(math.log(10000.0) / k_half))                       # (K//4,)
    sin_inp = idx_s.astype(jnp.float32)[..., None] * div_term   # (B, L, K//4)
    emb = jnp.concatenate([jnp.sin(sin_inp), jnp.cos(sin_inp)], axis=-1)  # (B, L, K//2)
    zeros = jnp.zeros_like(emb)
    # Zero-padded to full K lanes so all in-kernel adds/stores are lane-dense.
    pe_row = jnp.concatenate([emb, zeros], axis=-1).reshape(B, L, 1, K)  # emb(i) in 1st half
    pe_col = jnp.concatenate([zeros, emb], axis=-1).reshape(B, 1, L, K)  # emb(j) in 2nd half

    # --- tiling / grid --------------------------------------------------------
    ti = row_tile if row_tile is not None else _choose_row_tile(
        L, K, x.dtype.itemsize)
    assert L % ti == 0, "row_tile must divide L"
    grid = (B, L // ti)

    out = pl.pallas_call(
        _pe2d_add_kernel,
        out_shape=jax.ShapeDtypeStruct((B, L, L, K), x.dtype),
        grid=grid,
        in_specs=[
            pl.BlockSpec((1, ti, L, K), lambda b, t: (b, t, 0, 0)),   # x tile
            pl.BlockSpec((1, ti, 1, K), lambda b, t: (b, t, 0, 0)),   # pe_row tile
            pl.BlockSpec((1, 1, L, K), lambda b, t: (b, 0, 0, 0)),    # pe_col (per batch)
        ],
        out_specs=pl.BlockSpec((1, ti, L, K), lambda b, t: (b, t, 0, 0)),
        compiler_params=pltpu.CompilerParams(
            dimension_semantics=("parallel", "parallel"),
            vmem_limit_bytes=32 * 1024 * 1024),
    )(x, pe_row, pe_col)
    return out


def positional_encoding_2d_ref(x, idx_s):
    """Pure-JAX mirror of the PyTorch forward (eval mode, dropout = identity)."""
    B, L, _, K = x.shape
    k_half = K // 2
    div_term = jnp.exp(
        jnp.arange(0.0, k_half, 2.0, dtype=jnp.float32)
        * -(math.log(10000.0) / k_half))
    sin_inp = idx_s.astype(jnp.float32)[..., None] * div_term
    emb = jnp.concatenate([jnp.sin(sin_inp), jnp.cos(sin_inp)], axis=-1)
    pe = jnp.zeros_like(x)
    pe = pe.at[:, :, :, :k_half].set(
        jnp.broadcast_to(emb[:, :, None, :], (B, L, L, k_half)).astype(x.dtype))
    pe = pe.at[:, :, :, k_half:].set(
        jnp.broadcast_to(emb[:, None, :, :], (B, L, L, k_half)).astype(x.dtype))
    return x + pe


if __name__ == "__main__":
    key = jax.random.PRNGKey(0)
    kx, ki = jax.random.split(key)

    # Small shapes consistent with the module: d_model = 128 (multiple of 128
    # keeps the output tile lane-dense), L = 16 residues, batch 2.
    B, L, K = 2, 16, 128
    x = jax.random.normal(kx, (B, L, L, K), jnp.float32)
    idx_s = jnp.sort(jax.random.randint(ki, (B, L), 0, 256), axis=-1)

    out = positional_encoding_2d(x, idx_s)
    out = jax.block_until_ready(out)

    ref = positional_encoding_2d_ref(x, idx_s)
    assert out.shape == (B, L, L, K)
    assert jnp.allclose(out, ref, atol=1e-5, rtol=1e-5), "mismatch vs reference"

    print("KERNEL_OK")
</pallas_src>

<mosaic_0001>
module attributes {stable_mosaic.version = 11 : i64} {
  func.func @_pe2d_add_kernel(%arg0: i32, %arg1: i32, %arg2: memref<1x16x16x128xf32, #tpu.memory_space<vmem>>, %arg3: memref<1x16x1x128xf32, #tpu.memory_space<vmem>>, %arg4: memref<1x1x16x128xf32, #tpu.memory_space<vmem>>, %arg5: memref<1x16x16x128xf32, #tpu.memory_space<vmem>>) attributes {dimension_semantics = [#tpu.dimension_semantics<parallel>, #tpu.dimension_semantics<parallel>], iteration_bounds = array<i64: 2, 1>, scalar_prefetch = 0 : i64, scratch_operands = 0 : i64, tpu.core_type = #tpu.core_type<tc>, window_params = [{transform_indices = @transform_0, window_bounds = array<i64: 1, 16, 16, 128>}, {transform_indices = @transform_1, window_bounds = array<i64: 1, 16, 1, 128>}, {transform_indices = @transform_2, window_bounds = array<i64: 1, 1, 16, 128>}, {transform_indices = @transform_3, window_bounds = array<i64: 1, 16, 16, 128>}]} {
    %c0 = arith.constant 0 : index
    %c0_0 = arith.constant 0 : index
    %c0_1 = arith.constant 0 : index
    %c0_2 = arith.constant 0 : index
    %0 = vector.load %arg2[%c0, %c0_0, %c0_1, %c0_2] : memref<1x16x16x128xf32, #tpu.memory_space<vmem>>, vector<1x16x16x128xf32>
    %c0_3 = arith.constant 0 : index
    %c0_4 = arith.constant 0 : index
    %c0_5 = arith.constant 0 : index
    %c0_6 = arith.constant 0 : index
    %1 = vector.load %arg3[%c0_3, %c0_4, %c0_5, %c0_6] : memref<1x16x1x128xf32, #tpu.memory_space<vmem>>, vector<1x16x1x128xf32>
    %c0_7 = arith.constant 0 : index
    %c0_8 = arith.constant 0 : index
    %c0_9 = arith.constant 0 : index
    %c0_10 = arith.constant 0 : index
    %2 = vector.load %arg4[%c0_7, %c0_8, %c0_9, %c0_10] : memref<1x1x16x128xf32, #tpu.memory_space<vmem>>, vector<1x1x16x128xf32>
    %3 = vector.broadcast %1 : vector<1x16x1x128xf32> to vector<1x16x16x128xf32>
    %4 = arith.addf %0, %3 : vector<1x16x16x128xf32>
    %5 = vector.broadcast %2 : vector<1x1x16x128xf32> to vector<1x16x16x128xf32>
    %6 = arith.addf %4, %5 : vector<1x16x16x128xf32>
    %c0_11 = arith.constant 0 : index
    %c0_12 = arith.constant 0 : index
    %c0_13 = arith.constant 0 : index
    %c0_14 = arith.constant 0 : index
    %7 = vector.load %arg5[%c0_11, %c0_12, %c0_13, %c0_14] : memref<1x16x16x128xf32, #tpu.memory_space<vmem>>, vector<1x16x16x128xf32>
    tpu.vector_store %arg5[%c0_11, %c0_12, %c0_13, %c0_14], %6 {strides = array<i32>} : memref<1x16x16x128xf32, #tpu.memory_space<vmem>>, vector<1x16x16x128xf32>,
    return
  }
  func.func @transform_0(%arg0: i32, %arg1: i32) -> (i32, i32, i32, i32) {
    %c0_i32 = arith.constant 0 : i32
    %c0_i32_0 = arith.constant 0 : i32
    %c0_i32_1 = arith.constant 0 : i32
    return %arg0, %arg1, %c0_i32, %c0_i32_0 : i32, i32, i32, i32
  }
  func.func @transform_1(%arg0: i32, %arg1: i32) -> (i32, i32, i32, i32) {
    %c0_i32 = arith.constant 0 : i32
    %c0_i32_0 = arith.constant 0 : i32
    %c0_i32_1 = arith.constant 0 : i32
    return %arg0, %arg1, %c0_i32, %c0_i32_0 : i32, i32, i32, i32
  }
  func.func @transform_2(%arg0: i32, %arg1: i32) -> (i32, i32, i32, i32) {
    %c0_i32 = arith.constant 0 : i32
    %c0_i32_0 = arith.constant 0 : i32
    %c0_i32_1 = arith.constant 0 : i32
    %c0_i32_2 = arith.constant 0 : i32
    return %arg0, %c0_i32, %c0_i32_0, %c0_i32_1 : i32, i32, i32, i32
  }
  func.func @transform_3(%arg0: i32, %arg1: i32) -> (i32, i32, i32, i32) {
    %c0_i32 = arith.constant 0 : i32
    %c0_i32_0 = arith.constant 0 : i32
    %c0_i32_1 = arith.constant 0 : i32
    return %arg0, %arg1, %c0_i32, %c0_i32_0 : i32, i32, i32, i32
  }
}

</mosaic_0001>

<bundles_post_ra>
// kernel: tpu_custom_call.1
= control target key start
LH: loop header
LB: loop body
LE: loop exit
PB: predicated region body
PF: predicated region fallthrough
CT: control target
= control target key end

     0   :  { %s1411_s0 = inlined_call_operand.hbm [shape: f32[2,16,16,128], index: 0, kind: input, shape index: {}]   ;;  %s1412_s1 = inlined_call_operand.hbm [shape: f32[2,16,1,128], index: 1, kind: input, shape index: {}]   ;;  %s1413_s2 = inlined_call_operand.hbm [shape: f32[2,1,16,128], index: 2, kind: input, shape index: {}]   ;;  %s1414_s3 = inlined_call_operand.hbm [shape: f32[2,16,16,128], index: 3, kind: output, shape index: {}]  }
   0x1   :  { %1419 = sst [smem:[#allocation14_spill]] %s1412_s1 }
   0x2   :  { %8 = vsyncpa [#allocation3], 0 }
   0x3   :  { %10 = vsyncpa [#allocation3 + $0x1], 0 }
   0x4   :  { %11 = vsyncpa [#allocation6], 0 }
   0x5   :  { %13 = vsyncpa [#allocation6 + $0x1], 0 }
   0x6   :  { %14 = vsyncpa [#allocation4], 0 }
   0x7   :  { %16 = vsyncpa [#allocation4 + $0x1], 0  ;;  %s1013_s12 = smov 0   ;;  %s1015_s13 = smov 0  }
   0x8   :  { %s1017_s14 = smov 0   ;;  %s1019_s15 = smov 0  }
   0x9   :  { %s1021_s16 = smov 0   ;;  %s1023_s17 = smov 0  }
   0xa LB: > { %1420 = sst [smem:[#allocation12_spill]] %s977_s16  ;;  %s1044_s18 = sadd.s32 4294967295, %s981_s17   ;;  %s981_s17 = sphi %s1023_s17, %s22_s17   ;;  %s977_s16 = sphi %s1021_s16, %s1436_s16   ;;  %s973_s15 = sphi %s1019_s15, %s1435_s15   ;;  %s969_s14 = sphi %s1017_s14, %s1439_s14   ;;  %s965_s13 = sphi %s1015_s13, %s1438_s13   ;;  %s961_s12 = sphi %s1013_s12, %s1437_s12  }
   0xb   : > { %s685_s19 = sadd.s32 4294967294, %s981_s17   ;;  %s34_s20 = sadd.s32 1, %s977_s16 }
   0xc   : > { %s43_s21 = sadd.s32 1, %s969_s14  ;;  %p36_p0 = scmp.ge.s32.totalorder %s34_s20, 2 }
   0xd   : > { %p50_p1 = scmp.ne.s32.totalorder %s969_s14, %s965_s13  ;;  %p51_p2 = scmp.eq.s32.totalorder %s981_s17, 0 }
   0xe   : > { %p56_p3 = scmp.ne.s32.totalorder %s965_s13, %s961_s12  ;;  %s1441_s20 = smov (%p36_p0, %s34_s20), 0 }
   0xf   : > { %1421 = sst [smem:[#allocation13_spill]] %s1441_s20  ;;  %p1056_p4 = por %p51_p2, %p50_p1 }
  0x10   : > { %p57_p5 = scmp.eq.s32.totalorder %s1044_s18, 0  ;;  %s38_s23 = ssub.s32 %s977_s16, %s1441_s20 }
  0x11   : > { %p136_p6 = scmp.eq.s32.totalorder %s1044_s18, 1  ;;  %p41_p7 = scmp.eq.s32.totalorder %s38_s23, 0 }
  0x12   : > { %p1064_p8 = por %p57_p5, %p56_p3  ;;  %p142_p10 = scmp.eq.s32.totalorder %s685_s19, 1 }
  0x13   : > { %p1068_p9 = por %p136_p6, %p50_p1  ;;  %p749_p13 = scmp.lt.s32.totalorder %s981_s17, 2 }
  0x14   : > { %s1423_s24 = scalar_select %p1064_p8, 1, 0 }
  0x15   : > { %s1424_s25 = scalar_select %p1068_p9, 1, 0 }
  0x16   : > { %s1073_s26 = scalar_select %p41_p7, %s969_s14, %s43_s21  }
  0x17   : > { %p1075_p11 = por %p142_p10, %p56_p3  ;;  %s1082_s28 = sand.u32 1, %s969_s14  }
  0x18   : > { %s186_s29 = sand.u32 1, %s981_s17   ;;  %s691_s30 = sshll.u32 %s1082_s28, 4 }
  0x19   : > { %s1425_s27 = scalar_select %p1075_p11, 1, 0 }
  0x1a   : > { %p1088_p0 = pnand %p749_p13, %p1056_p4  ;;  %s724_s5 = sshll.u32 %s977_s16, 8 }
  0x1b   : > { %s1427_s1 = sld [smem:[#allocation14_spill]]  ;;  %s190_s9 = scalar_lea.vmem [#allocation5], %s691_s30 }
  0x1c   : > { %s199_s10 = sshll.u32 %s190_s9, 4  ;;  %s1104_s11 = scalar_lea.sflag [#allocation6], %s186_s29  ;;  %s1102_s10 = int_to_ptr.vmem [resolvable:$true] %s199_s10 }
  0x1d   : > { %p1110_p2 = pneg %p1088_p0 }
  0x21   : > { %s1098_s8 = scalar_lea.hbm %s1427_s1, %s724_s5  ;;  %s810_s6 = scalar_lea.hbm %s1427_s1, 512 }
  0x22   : > { %s805_s19 = scalar_lea.hbm %s1098_s8, 256  ;;  %p811_p5 = scmp.lt.u32.totalorder %s1098_s8, %s1427_s1 }
  0x23   : > { %p806_p1 = scmp.ne.s32.totalorder %s1098_s8, %s805_s19  ;;  %p812_p6 = scmp.lt.u32.totalorder %s810_s6, %s805_s19 }
  0x24   : > { %p814_p10 = scmp.lt.u32.totalorder %s805_s19, %s1098_s8 }
  0x25   : > { %p808_p3 = pnand %p1110_p2, %p806_p1  ;;  %p813_p7 = por %p812_p6, %p811_p5 }
  0x27   : > { %p809_p4 = pneg %p808_p3  ;;  %p815_p13 = por %p814_p10, %p813_p7 }
  0x29   : > { %p816_p12 = pnand %p815_p13, %p809_p4 }
  0x2b   : > { %819 = shalt.err (!%p816_p12)
}
  0x2c   : > { %s820_s29 = scalar_lea.vmem %s1102_s10, 256  ;;  %s983_s22 = smov [#allocation5]  }
  0x2d   : > { %p821_p1 = scmp.ne.s32.totalorder %s1102_s10, %s820_s29  ;;  %s825_s23 = sshll.u32 %s983_s22, 4  ;;  %s826_s23 = int_to_ptr.vmem [resolvable:$false] %s825_s23 }
  0x2e   : > { %s827_s7 = scalar_lea.vmem %s826_s23, 512  ;;  %p828_p9 = scmp.lt.s32.totalorder %s1102_s10, %s826_s23 }
  0x2f   : > { %p823_p3 = pnand %p821_p1, %p1110_p2  ;;  %p829_p8 = scmp.lt.s32.totalorder %s827_s7, %s820_s29 }
  0x31   : > { %p824_p11 = pneg %p823_p3  ;;  %p830_p5 = por %p829_p8, %p828_p9 }
  0x33   : > { %p831_p6 = pnand %p830_p5, %p824_p11 }
  0x35   : > { %834 = shalt.err (!%p831_p6)
}
  0x36   : > { %s984_s19 = smov 16   ;;  %s985_s6 = smov 1  }
  0x37   : > { %741 = dma.hbm_to_vmem [thread:$0]  (!%p1088_p0), %s1098_s8, 256, %s1102_s10, %s1104_s11, %s984_s19, %s984_s19, %s985_s6  }
  0x38   : > { %s1139_s22 = scalar_lea.hbm %s1413_s2, %s724_s5  ;;  %s213_s23 = scalar_lea.vmem [#allocation7], %s691_s30 }
  0x39   : > { %s220_s7 = sshll.u32 %s213_s23, 4  ;;  %p697_p8 = scmp.ge.s32.totalorder %s981_s17, 1  ;;  %s1144_s7 = int_to_ptr.vmem [resolvable:$true] %s220_s7 }
  0x3a   : > { %p228_p9 = scmp.lt.s32.totalorder %s981_s17, 3  ;;  %s688_s20 = sshll.u32 %s1082_s28, 8 }
  0x3b   : > { %s723_s8 = sshll.u32 %s977_s16, 12  ;;  %s166_s30 = scalar_lea.vmem [#allocation2], %s688_s20 }
  0x3c   : > { %p1147_p11 = pnand %p697_p8, %p228_p9  ;;  %s1156_s6 = scalar_lea.hbm %s1411_s0, %s723_s8 }
  0x3d   : > { %s176_s5 = sshll.u32 %s166_s30, 4  ;;  %s163_s9 = scalar_lea.sflag [#allocation3], %s1082_s28  ;;  %s1158_s5 = int_to_ptr.vmem [resolvable:$true] %s176_s5 }
  0x3e   : > { %s1429_s1 = scalar_select %p1147_p11, 1, 0 }
  0x3f   : > { %s835_s29 = scalar_lea.hbm %s1156_s6, 4096  ;;  %s840_s10 = scalar_lea.hbm %s1411_s0, 8192 }
  0x40   : > { %p836_p12 = scmp.ne.s32.totalorder %s1156_s6, %s835_s29  ;;  %p841_p10 = scmp.lt.u32.totalorder %s1156_s6, %s1411_s0 }
  0x41   : > { %p842_p13 = scmp.lt.u32.totalorder %s840_s10, %s835_s29  ;;  %p844_p3 = scmp.lt.u32.totalorder %s835_s29, %s1156_s6 }
  0x42   : > { %p838_p4 = pnand %p836_p12, %p1110_p2 }
  0x43   : > { %p843_p1 = por %p842_p13, %p841_p10 }
  0x44   : > { %p839_p7 = pneg %p838_p4 }
  0x45   : > { %p845_p5 = por %p844_p3, %p843_p1 }
  0x47   : > { %p846_p6 = pnand %p845_p5, %p839_p7 }
  0x49   : > { %849 = shalt.err (!%p846_p6)
}
  0x4a   : > { %s850_s20 = scalar_lea.vmem %s1158_s5, 4096  ;;  %s986_s16 = smov [#allocation2]  }
  0x4b   : > { %p851_p8 = scmp.ne.s32.totalorder %s1158_s5, %s850_s20  ;;  %s855_s30 = sshll.u32 %s986_s16, 4  ;;  %s856_s30 = int_to_ptr.vmem [resolvable:$false] %s855_s30 }
  0x4c   : > { %s857_s23 = scalar_lea.vmem %s856_s30, 8192  ;;  %p858_p4 = scmp.lt.s32.totalorder %s1158_s5, %s856_s30 }
  0x4d   : > { %p853_p9 = pnand %p851_p8, %p1110_p2  ;;  %p859_p11 = scmp.lt.s32.totalorder %s857_s23, %s850_s20 }
  0x4f   : > { %p854_p12 = pneg %p853_p9  ;;  %p860_p10 = por %p859_p11, %p858_p4 }
  0x51   : > { %p861_p13 = pnand %p860_p10, %p854_p12 }
  0x53   : > { %864 = shalt.err (!%p861_p13)
}
  0x54   : > { %s987_s29 = smov 128   ;;  %s988_s10 = smov 8  }
  0x55   : > { %738 = dma.hbm_to_vmem [thread:$0]  (!%p1088_p0), %s1156_s6, 4096, %s1158_s5, %s163_s9, %s987_s29, %s987_s29, %s988_s10  }
  0x56   : > { %s865_s8 = scalar_lea.hbm %s1139_s22, 256  ;;  %s870_s16 = scalar_lea.hbm %s1413_s2, 512 }
  0x57   : > { %p866_p11 = scmp.ne.s32.totalorder %s1139_s22, %s865_s8  ;;  %p871_p3 = scmp.lt.u32.totalorder %s1139_s22, %s1413_s2 }
  0x58   : > { %p872_p5 = scmp.lt.u32.totalorder %s870_s16, %s865_s8  ;;  %p874_p8 = scmp.lt.u32.totalorder %s865_s8, %s1139_s22 }
  0x59   : > { %p868_p7 = pnand %p866_p11, %p1110_p2 }
  0x5a   : > { %p873_p6 = por %p872_p5, %p871_p3 }
  0x5b   : > { %p869_p1 = pneg %p868_p7 }
  0x5c   : > { %p875_p9 = por %p874_p8, %p873_p6 }
  0x5e   : > { %p876_p12 = pnand %p875_p9, %p869_p1 }
  0x60   : > { %879 = shalt.err (!%p876_p12)
}
  0x61   : > { %s880_s28 = scalar_lea.vmem %s1144_s7, 256  ;;  %s989_s6 = smov [#allocation7]  }
  0x62   : > { %p881_p4 = scmp.ne.s32.totalorder %s1144_s7, %s880_s28  ;;  %s885_s5 = sshll.u32 %s989_s6, 4  ;;  %s886_s5 = int_to_ptr.vmem [resolvable:$false] %s885_s5 }
  0x63   : > { %s887_s9 = scalar_lea.vmem %s886_s5, 512  ;;  %p888_p11 = scmp.lt.s32.totalorder %s1144_s7, %s886_s5 }
  0x64   : > { %p883_p10 = pnand %p881_p4, %p1110_p2  ;;  %p889_p7 = scmp.lt.s32.totalorder %s887_s9, %s880_s28 }
  0x66   : > { %p884_p13 = pneg %p883_p10  ;;  %p890_p3 = por %p889_p7, %p888_p11 }
  0x68   : > { %p891_p5 = pnand %p890_p3, %p884_p13 }
  0x6a   : > { %894 = shalt.err (!%p891_p5)
}
  0x6b   : > { %744 = dma.hbm_to_vmem [thread:$0]  (!%p1088_p0), %s1139_s22, 256, %s1144_s7, %s1104_s11, %s987_s29, %s987_s29, %s988_s10  }
  0x6c   : > { %p1430_p2 = scmp.ne.s32.totalorder %s1429_s1, 0 }
  0x6d   : > { %s1215_s21 = sand.u32 (!%p1430_p2), 1, %s965_s13   ;;  %p1431_p1 = scmp.ne.s32.totalorder (!%p1430_p2), %s1423_s24, 0 }
  0x6e   : > { %232 = sbr.rel (%p1430_p2) target bundleno = 161 (0xa1), region = 32  ;;  %s698_s8 = sshll.u32 (!%p1430_p2), %s1215_s21, 8 }
  0x6f   : > { %s235_s19 = scalar_lea.sflag (!%p1430_p2), [#allocation3], %s1215_s21  ;;  %s1221_s4 = scalar_lea.vmem (!%p1430_p2), [#allocation2], %s698_s8 }
  0x75   : > { %948 = dma.done.wait (%p1431_p1), %s235_s19, 4096  }
  0x76   : > { %950 = vsyncadd (%p1431_p1), %s235_s19, 4294963200  ;;  %s243_s1 = sand.u32 1, %s1044_s18   ;;  %s699_s11 = sshll.u32 %s1215_s21, 4 }
  0x77   : > { %s244_s22 = scalar_lea.sflag [#allocation6], %s243_s1  ;;  %s1229_s7 = scalar_lea.vmem [#allocation5], %s699_s11 }
  0x78   : > { %952 = dma.done.wait (%p1431_p1), %s244_s22, 512  }
  0x79   : > { %954 = vsyncadd (%p1431_p1), %s244_s22, 4294966784  ;;  %v292_v0 = vld [vmem:[%s1221_s4] sm:$0xff]  ;;  %s256_s18 = scalar_lea.vmem [#allocation7], %s699_s11  ;;  %v293_v4 = vld [vmem:[%s1221_s4 + $0x8] sm:$0xff]  ;;  %s1256_s24 = scalar_lea.vmem [#allocation8], %s698_s8 }
  0x7a   : > { %v702_v1 = vld [vmem:[%s1229_s7] ss:$0 sm:$0xff]  ;;  %v1240_v5 = vld [vmem:[%s256_s18 + $0x8] sm:$0xff]  ;;  %v703_v8 = vld [vmem:[%s1229_s7 + $0x1] ss:$0 sm:$0xff]  ;;  %s726_s29 = sshll.u32 %s973_s15, 12 }
  0x7b   : > { %v1237_v2 = vld [vmem:[%s256_s18] sm:$0xff]  ;;  %v438_v3 = vadd.f32 %v702_v1, %v292_v0  ;;  %v439_v7 = vadd.f32 %v702_v1, %v293_v4  ;;  %v295_v9 = vld [vmem:[%s1221_s4 + $0x18] sm:$0xff]  ;;  %v297_v15 = vld [vmem:[%s1221_s4 + $0x28] sm:$0xff]  ;;  %s551_s10 = sshll.u32 %s1256_s24, 4  ;;  %s1352_s16 = scalar_lea.hbm %s1414_s3, %s726_s29  ;;  %s1354_s10 = int_to_ptr.vmem [resolvable:$true] %s551_s10 }
  0x7c   : > { %v294_v6 = vld [vmem:[%s1221_s4 + $0x10] sm:$0xff]  ;;  %v296_v10 = vld [vmem:[%s1221_s4 + $0x20] sm:$0xff]  ;;  %v441_v13 = vadd.f32 %v703_v8, %v295_v9  ;;  %v299_v21 = vld [vmem:[%s1221_s4 + $0x38] sm:$0xff]  ;;  %s535_s30 = scalar_lea.sflag [#allocation4], %s1215_s21  ;;  %s895_s23 = scalar_lea.vmem %s1354_s10, 4096 }
  0x7d   : > { %v470_v11 = vadd.f32 %v438_v3, %v1237_v2  ;;  %v440_v12 = vadd.f32 %v703_v8, %v294_v6  ;;  %v704_v14 = vld [vmem:[%s1229_s7 + $0x2] ss:$0 sm:$0xff]  ;;  %v471_v17 = vadd.f32 %v439_v7, %v1240_v5  ;;  %v705_v20 = vld [vmem:[%s1229_s7 + $0x3] ss:$0 sm:$0xff]  ;;  %v706_v27 = vld [vmem:[%s1229_s7 + $0x4] ss:$0 sm:$0xff]  ;;  %p896_p0 = scmp.ne.s32.totalorder %s1354_s10, %s895_s23 }
  0x7e   : > { %v298_v16 = vld [vmem:[%s1221_s4 + $0x30] sm:$0xff]  ;;  %v442_v18 = vadd.f32 %v704_v14, %v296_v10  ;;  %v443_v19 = vadd.f32 %v704_v14, %v297_v15  ;;  %v300_v22 = vld [vmem:[%s1221_s4 + $0x40] sm:$0xff]  ;;  %v473_v24 = vadd.f32 %v441_v13, %v1240_v5  ;;  %v445_v26 = vadd.f32 %v705_v20, %v299_v21  ;;  %v301_v28 = vld [vmem:[%s1221_s4 + $0x48] sm:$0xff]  ;;  %p1432_p6 = scmp.ne.s32.totalorder %s1424_s25, 0  ;;  %s990_s28 = smov [#allocation8]  }
  0x7f   : > { %502 = vst [vmem:[%s1256_s24] sm:$0xff] %v470_v11  ;;  %v472_v23 = vadd.f32 %v440_v12, %v1237_v2  ;;  %v444_v25 = vadd.f32 %v705_v20, %v298_v16  ;;  %v302_v29 = vld [vmem:[%s1221_s4 + $0x50] sm:$0xff]  ;;  %503 = vst [vmem:[%s1256_s24 + $0x8] sm:$0xff] %v471_v17  ;;  %v446_v32 = vadd.f32 %v706_v27, %v300_v22  ;;  %v303_v35 = vld [vmem:[%s1221_s4 + $0x58] sm:$0xff]  ;;  %s899_s6 = sshll.u32 %s990_s28, 4  ;;  %s900_s6 = int_to_ptr.vmem [resolvable:$false] %s899_s6 }
  0x80   : > { %v474_v30 = vadd.f32 %v442_v18, %v1237_v2  ;;  %v475_v31 = vadd.f32 %v443_v19, %v1240_v5  ;;  %v447_v33 = vadd.f32 %v706_v27, %v301_v28  ;;  %v707_v34 = vld [vmem:[%s1229_s7 + $0x5] ss:$0 sm:$0xff]  ;;  %505 = vst [vmem:[%s1256_s24 + $0x18] sm:$0xff] %v473_v24  ;;  %v477_v38 = vadd.f32 %v445_v26, %v1240_v5  ;;  %v708_v41 = vld [vmem:[%s1229_s7 + $0x6] ss:$0 sm:$0xff]  ;;  %v305_v42 = vld [vmem:[%s1221_s4 + $0x68] sm:$0xff]  ;;  %p897_p8 = pnand %p896_p0, %p1432_p6  ;;  %p902_p12 = scmp.lt.s32.totalorder %s1354_s10, %s900_s6 }
  0x81   : > { %v304_v36 = vld [vmem:[%s1221_s4 + $0x60] sm:$0xff]  ;;  %504 = vst [vmem:[%s1256_s24 + $0x10] sm:$0xff] %v472_v23  ;;  %v476_v37 = vadd.f32 %v444_v25, %v1237_v2  ;;  %v448_v39 = vadd.f32 %v707_v34, %v302_v29  ;;  %v449_v40 = vadd.f32 %v707_v34, %v303_v35  ;;  %v306_v43 = vld [vmem:[%s1221_s4 + $0x70] sm:$0xff]  ;;  %v478_v44 = vadd.f32 %v446_v32, %v1237_v2  ;;  %v307_v49 = vld [vmem:[%s1221_s4 + $0x78] sm:$0xff]  ;;  %s901_s5 = scalar_lea.vmem %s900_s6, 8192 }
  0x82   : > { %506 = vst [vmem:[%s1256_s24 + $0x20] sm:$0xff] %v474_v30  ;;  %507 = vst [vmem:[%s1256_s24 + $0x28] sm:$0xff] %v475_v31  ;;  %v479_v45 = vadd.f32 %v447_v33, %v1240_v5  ;;  %v450_v46 = vadd.f32 %v708_v41, %v304_v36  ;;  %v451_v47 = vadd.f32 %v708_v41, %v305_v42  ;;  %v709_v48 = vld [vmem:[%s1229_s7 + $0x7] ss:$0 sm:$0xff]  ;;  %v710_v55 = vld [vmem:[%s1229_s7 + $0x8] ss:$0 sm:$0xff]  ;;  %p898_p9 = pneg %p897_p8  ;;  %p903_p4 = scmp.lt.s32.totalorder %s901_s5, %s895_s23 }
  0x83   : > { %v308_v50 = vld [vmem:[%s1221_s4 + $0x80] sm:$0xff]  ;;  %508 = vst [vmem:[%s1256_s24 + $0x30] sm:$0xff] %v476_v37  ;;  %509 = vst [vmem:[%s1256_s24 + $0x38] sm:$0xff] %v477_v38  ;;  %v480_v51 = vadd.f32 %v448_v39, %v1237_v2  ;;  %v481_v52 = vadd.f32 %v449_v40, %v1240_v5  ;;  %v452_v53 = vadd.f32 %v709_v48, %v306_v43  ;;  %v309_v56 = vld [vmem:[%s1221_s4 + $0x88] sm:$0xff] }
  0x84   : > { %v453_v54 = vadd.f32 %v709_v48, %v307_v49  ;;  %v310_v57 = vld [vmem:[%s1221_s4 + $0x90] sm:$0xff]  ;;  %510 = vst [vmem:[%s1256_s24 + $0x40] sm:$0xff] %v478_v44  ;;  %511 = vst [vmem:[%s1256_s24 + $0x48] sm:$0xff] %v479_v45  ;;  %v482_v58 = vadd.f32 %v450_v46, %v1237_v2  ;;  %v483_v59 = vadd.f32 %v451_v47, %v1240_v5  ;;  %v711_v62 = vld [vmem:[%s1229_s7 + $0x9] ss:$0 sm:$0xff]  ;;  %p904_p10 = por %p903_p4, %p902_p12 }
  0x85   : > { %v454_v60 = vadd.f32 %v710_v55, %v308_v50  ;;  %v455_v61 = vadd.f32 %v710_v55, %v309_v56  ;;  %v311_v63 = vld [vmem:[%s1221_s4 + $0x98] sm:$0xff]  ;;  %v312_v0 = vld [vmem:[%s1221_s4 + $0xa0] sm:$0xff]  ;;  %512 = vst [vmem:[%s1256_s24 + $0x50] sm:$0xff] %v480_v51  ;;  %513 = vst [vmem:[%s1256_s24 + $0x58] sm:$0xff] %v481_v52  ;;  %v484_v1 = vadd.f32 %v452_v53, %v1237_v2 }
  0x86   : > { %v485_v3 = vadd.f32 %v453_v54, %v1240_v5  ;;  %v456_v4 = vadd.f32 %v711_v62, %v310_v57  ;;  %v457_v6 = vadd.f32 %v711_v62, %v311_v63  ;;  %v712_v7 = vld [vmem:[%s1229_s7 + $0xa] ss:$0 sm:$0xff]  ;;  %v314_v9 = vld [vmem:[%s1221_s4 + $0xb0] sm:$0xff]  ;;  %514 = vst [vmem:[%s1256_s24 + $0x60] sm:$0xff] %v482_v58  ;;  %515 = vst [vmem:[%s1256_s24 + $0x68] sm:$0xff] %v483_v59  ;;  %p905_p13 = pnand %p904_p10, %p898_p9 }
  0x87   : > { %v313_v8 = vld [vmem:[%s1221_s4 + $0xa8] sm:$0xff]  ;;  %v486_v10 = vadd.f32 %v454_v60, %v1237_v2  ;;  %v487_v11 = vadd.f32 %v455_v61, %v1240_v5  ;;  %v458_v12 = vadd.f32 %v712_v7, %v312_v0  ;;  %v315_v15 = vld [vmem:[%s1221_s4 + $0xb8] sm:$0xff]  ;;  %v316_v16 = vld [vmem:[%s1221_s4 + $0xc0] sm:$0xff]  ;;  %516 = vst [vmem:[%s1256_s24 + $0x70] sm:$0xff] %v484_v1 }
  0x88   : > { %v459_v13 = vadd.f32 %v712_v7, %v313_v8  ;;  %v713_v14 = vld [vmem:[%s1229_s7 + $0xb] ss:$0 sm:$0xff]  ;;  %517 = vst [vmem:[%s1256_s24 + $0x78] sm:$0xff] %v485_v3  ;;  %v488_v17 = vadd.f32 %v456_v4, %v1237_v2  ;;  %v489_v18 = vadd.f32 %v457_v6, %v1240_v5  ;;  %v714_v21 = vld [vmem:[%s1229_s7 + $0xc] ss:$0 sm:$0xff]  ;;  %v318_v23 = vld [vmem:[%s1221_s4 + $0xd0] sm:$0xff] }
  0x89   : > { %v460_v19 = vadd.f32 %v713_v14, %v314_v9  ;;  %v461_v20 = vadd.f32 %v713_v14, %v315_v15  ;;  %v317_v22 = vld [vmem:[%s1221_s4 + $0xc8] sm:$0xff]  ;;  %518 = vst [vmem:[%s1256_s24 + $0x80] sm:$0xff] %v486_v10  ;;  %519 = vst [vmem:[%s1256_s24 + $0x88] sm:$0xff] %v487_v11  ;;  %v490_v24 = vadd.f32 %v458_v12, %v1237_v2  ;;  %v319_v29 = vld [vmem:[%s1221_s4 + $0xd8] sm:$0xff] }
  0x8a   : > { %v491_v25 = vadd.f32 %v459_v13, %v1240_v5  ;;  %v462_v26 = vadd.f32 %v714_v21, %v316_v16  ;;  %v463_v27 = vadd.f32 %v714_v21, %v317_v22  ;;  %v715_v28 = vld [vmem:[%s1229_s7 + $0xd] ss:$0 sm:$0xff]  ;;  %v320_v30 = vld [vmem:[%s1221_s4 + $0xe0] sm:$0xff]  ;;  %520 = vst [vmem:[%s1256_s24 + $0x90] sm:$0xff] %v488_v17  ;;  %521 = vst [vmem:[%s1256_s24 + $0x98] sm:$0xff] %v489_v18 }
  0x8b   : > { %v492_v31 = vadd.f32 %v460_v19, %v1237_v2  ;;  %v493_v32 = vadd.f32 %v461_v20, %v1240_v5  ;;  %v464_v33 = vadd.f32 %v715_v28, %v318_v23  ;;  %v465_v34 = vadd.f32 %v715_v28, %v319_v29  ;;  %v716_v35 = vld [vmem:[%s1229_s7 + $0xe] ss:$0 sm:$0xff]  ;;  %v322_v37 = vld [vmem:[%s1221_s4 + $0xf0] sm:$0xff]  ;;  %522 = vst [vmem:[%s1256_s24 + $0xa0] sm:$0xff] %v490_v24  ;;  %v717_v42 = vld [vmem:[%s1229_s7 + $0xf] ss:$0 sm:$0xff] }
  0x8c   : > { %v321_v36 = vld [vmem:[%s1221_s4 + $0xe8] sm:$0xff]  ;;  %523 = vst [vmem:[%s1256_s24 + $0xa8] sm:$0xff] %v491_v25  ;;  %v494_v38 = vadd.f32 %v462_v26, %v1237_v2  ;;  %v495_v39 = vadd.f32 %v463_v27, %v1240_v5  ;;  %v466_v40 = vadd.f32 %v716_v35, %v320_v30  ;;  %v323_v43 = vld [vmem:[%s1221_s4 + $0xf8] sm:$0xff]  ;;  %v468_v46 = vadd.f32 %v717_v42, %v322_v37 }
  0x8d   : > { %v467_v41 = vadd.f32 %v716_v35, %v321_v36  ;;  %524 = vst [vmem:[%s1256_s24 + $0xb0] sm:$0xff] %v492_v31  ;;  %525 = vst [vmem:[%s1256_s24 + $0xb8] sm:$0xff] %v493_v32  ;;  %v496_v44 = vadd.f32 %v464_v33, %v1237_v2  ;;  %v497_v45 = vadd.f32 %v465_v34, %v1240_v5 }
  0x8e   : > { %v469_v47 = vadd.f32 %v717_v42, %v323_v43  ;;  %526 = vst [vmem:[%s1256_s24 + $0xc0] sm:$0xff] %v494_v38  ;;  %527 = vst [vmem:[%s1256_s24 + $0xc8] sm:$0xff] %v495_v39  ;;  %v498_v48 = vadd.f32 %v466_v40, %v1237_v2  ;;  %v500_v50 = vadd.f32 %v468_v46, %v1237_v2 }
  0x8f   : > { %v499_v49 = vadd.f32 %v467_v41, %v1240_v5  ;;  %528 = vst [vmem:[%s1256_s24 + $0xd0] sm:$0xff] %v496_v44  ;;  %529 = vst [vmem:[%s1256_s24 + $0xd8] sm:$0xff] %v497_v45 }
  0x90   : > { %v501_v51 = vadd.f32 %v469_v47, %v1240_v5  ;;  %530 = vst [vmem:[%s1256_s24 + $0xe0] sm:$0xff] %v498_v48  ;;  %532 = vst [vmem:[%s1256_s24 + $0xf0] sm:$0xff] %v500_v50 }
  0x91   : > { %531 = vst [vmem:[%s1256_s24 + $0xe8] sm:$0xff] %v499_v49 }
  0x92   : > { %533 = vst [vmem:[%s1256_s24 + $0xf8] sm:$0xff] %v501_v51 }
  0x93   : > { %908 = shalt.err (!%p905_p13)
}
  0x94   : > { %s909_s9 = scalar_lea.hbm %s1352_s16, 4096  ;;  %s913_s4 = scalar_lea.hbm %s1414_s3, 8192 }
  0x95   : > { %p910_p11 = scmp.ne.s32.totalorder %s1352_s16, %s909_s9  ;;  %p914_p5 = scmp.lt.u32.totalorder %s1352_s16, %s1414_s3 }
  0x96   : > { %p915_p2 = scmp.lt.u32.totalorder %s913_s4, %s909_s9  ;;  %p917_p0 = scmp.lt.u32.totalorder %s909_s9, %s1352_s16 }
  0x97   : > { %p911_p7 = pnand %p910_p11, %p1432_p6 }
  0x98   : > { %p916_p1 = por %p915_p2, %p914_p5 }
  0x99   : > { %p912_p3 = pneg %p911_p7 }
  0x9a   : > { %p918_p8 = por %p917_p0, %p916_p1 }
  0x9c   : > { %p919_p9 = pnand %p918_p8, %p912_p3 }
  0x9e   : > { %922 = shalt.err (!%p919_p9)
}
  0x9f   : > { %s991_s22 = smov 128   ;;  %s992_s7 = smov 8  }
  0xa0   : > { %733 = dma.vmem_to_hbm [thread:$0]  (%p1432_p6), %s1354_s10, 4096, %s1352_s16, %s535_s30, %s991_s22, %s991_s22, %s992_s7  }
  0xa1 PF: > { %s566_s18 = sand.u32 1, %s961_s12   ;;  %p1433_p12 = scmp.ne.s32.totalorder %s1425_s27, 0 }
  0xa2   : > { %p1434_p4 = scmp.ge.s32.totalorder %s981_s17, 2  ;;  %s567_s24 = scalar_lea.sflag [#allocation4], %s566_s18 }
  0xa4   : > { %p746_p10 = pnand %p1434_p4, %p1433_p12 }
  0xa6   : > { %956 = dma.done.wait (!%p746_p10), %s567_s24, 4096  }
  0xa7   : > { %958 = vsyncadd (!%p746_p10), %s567_s24, 4294963200  ;;  %s22_s17 = sadd.s32 1, %s981_s17   ;;  %s1435_s15 = sld [smem:[#allocation12_spill]] }
  0xa8   : > { %p19_p13 = scmp.ge.s32.totalorder %s22_s17, 4   ;;  %s1436_s16 = sld [smem:[#allocation13_spill]] }
  0xa9   : > { %s1437_s12 = smov %s965_s13  ;;  %s1438_s13 = smov %s969_s14 }
  0xaa   : > { %s1439_s14 = smov %s1073_s26  ;;  %21 = sbr.rel (!%p19_p13) target bundleno = 10 (0xa), region = 101 }
  0xb1   :  { %572 = vsyncpa [#allocation3], 1 }
  0xb2   :  { %574 = vsyncpa [#allocation3 + $0x1], 1 }
  0xb3   :  { %575 = vsyncpa [#allocation6], 1 }
  0xb4   :  { %577 = vsyncpa [#allocation6 + $0x1], 1 }
  0xb5   :  { %578 = vsyncpa [#allocation4], 1 }
  0xb6   :  { %580 = vsyncpa [#allocation4 + $0x1], 1 }

</bundles_post_ra>
